<compile_context>
chip_gen: v6e
topology: v6e:2x2x1
jax: 0.10.0
libtpu: 0.0.40
codegen_flags: <defaults>
</compile_context>

<pallas_src>
import jax
import jax.numpy as jnp
from jax.experimental import pallas as pl
from jax.experimental.pallas import tpu as pltpu


def fnn_mlp_kernel(xeT_ref, w1t_ref, b1_ref, w2t_ref, b2_ref, wo_ref, bo_ref, out_ref):
    # Layer 1: (H1, E) @ (E, tb) -> (H1, tb); prob + BN already folded into w1t/b1.
    h = jnp.dot(w1t_ref[...], xeT_ref[...], preferred_element_type=jnp.float32)
    h = jnp.maximum(h + b1_ref[...], 0.0)                      # bias/ReLU in f32 (lane-dense)

    # Layer 2: (H2, H1) @ (H1, tb) -> (H2, tb); BN folded into w2t/b2.
    h = jnp.dot(w2t_ref[...], h.astype(w2t_ref.dtype),
                preferred_element_type=jnp.float32)
    h = jnp.maximum(h + b2_ref[...], 0.0)

    # Output Linear(last_dim, 1): cross-sublane reduction -> naturally lane-dense (1, tb).
    out_ref[...] = jnp.sum(h * wo_ref[...], axis=0, keepdims=True) + bo_ref[...]


def fnn_search_forward(x_idx, arch, beta, params, *, tile_b=8192,
                       compute_dtype=jnp.bfloat16):
    """Returns score of shape (B,) — matches score.squeeze(1) in the PyTorch module."""
    emb = params["embedding"]
    B, F_ = x_idx.shape
    D = emb.shape[1]
    E = F_ * D
    H1 = params["w1"].shape[1]
    H2 = params["w2"].shape[1]
    eps = 1e-5

    # ---------- glue (plain JAX): softmax over arch + BN(eval) folding ----------
    prob = jax.nn.softmax(arch.astype(jnp.float32) / beta, axis=0)        # (F,)
    prob_rep = jnp.repeat(prob, D)                                        # (E,) field-major

    def fold_bn(gamma, beta_bn, mean, var):
        scale = gamma.astype(jnp.float32) / jnp.sqrt(var.astype(jnp.float32) + eps)
        shift = beta_bn.astype(jnp.float32) - mean.astype(jnp.float32) * scale
        return scale, shift

    s1, t1 = fold_bn(*params["bn1"])
    s2, t2 = fold_bn(*params["bn2"])

    # Batch-on-lanes layout: weights live transposed, biases are (H, 1) columns.
    # (xe * prob) @ w1 == xe @ (prob_rows * w1);  BN(eval) folds onto columns + bias.
    w1t = (params["w1"].astype(jnp.float32)
           * prob_rep[:, None] * s1[None, :]).T.astype(compute_dtype)      # (H1, E)
    b1c = (params["b1"].astype(jnp.float32).reshape(-1) * s1 + t1).reshape(H1, 1)
    w2t = (params["w2"].astype(jnp.float32) * s2[None, :]).T.astype(compute_dtype)  # (H2, H1)
    b2c = (params["b2"].astype(jnp.float32).reshape(-1) * s2 + t2).reshape(H2, 1)
    wo_col = params["wo"].astype(jnp.float32).reshape(H2, 1)               # f32 (VPU/XLU path)
    bo = params["bo"].astype(jnp.float32).reshape(1, 1)

    # Embedding gather (data-dependent) stays in XLA, emitted in the (E, B)
    # batch-on-lanes layout and in the compute dtype.
    # TODO(synk): fuse this gather into the kernel (VMEM-resident table + in-kernel
    # jnp.take / DMA gather) to stream only 4*F bytes of indices per row.
    xv = jnp.take(emb, x_idx, axis=0)                                      # (B, F, D)
    xeT = xv.astype(compute_dtype).reshape(B, E).T                         # (E, B)

    # ---------- batch tiling: batch lives on the lane axis ----------
    tb = max(128, (int(tile_b) // 128) * 128)          # lane-aligned tiles
    two_step = pl.cdiv(pl.cdiv(B, 2), 128) * 128       # keep >= 2 grid steps when possible
    tb = min(tb, max(128, two_step))                   #   (v7x megacore sharding)
    grid = (pl.cdiv(B, tb),)                           # ragged last block, no jnp.pad

    itemsize = jnp.dtype(compute_dtype).itemsize
    cost = pl.CostEstimate(
        flops=2 * B * (E * H1 + H1 * H2 + H2),
        transcendentals=0,
        bytes_accessed=(B * E * itemsize                     # streamed xeT
                        + (E * H1 + H1 * H2) * itemsize      # resident weights
                        + (H1 + H2 + 2) * 4                  # biases / wo / bo
                        + B * 4),                            # output scores
    )

    # VMEM budget: double-buffered streamed tile + output + resident weights + body temps.
    weights_bytes = (E * H1 + H1 * H2) * itemsize + (H1 + H2 + 2) * 4
    body_temps = (H1 + H2 + 2) * tb * 4                  # f32 intermediates inside the body
    need = (2 * (E * tb * itemsize) + 2 * (tb * 4)
            + weights_bytes + body_temps + (2 << 20))
    vmem_limit = int(min(max(need, 16 << 20), 48 << 20))  # fits v5e/v6e/v7x budgets

    resident = lambda i: (0, 0)
    out = pl.pallas_call(
        fnn_mlp_kernel,
        out_shape=jax.ShapeDtypeStruct((1, B), jnp.float32),
        grid=grid,
        in_specs=[
            pl.BlockSpec((E, tb), lambda i: (0, i)),    # streamed activation tile (lane-dense)
            pl.BlockSpec((H1, E), resident),            # resident folded, transposed weights
            pl.BlockSpec((H1, 1), resident),
            pl.BlockSpec((H2, H1), resident),
            pl.BlockSpec((H2, 1), resident),
            pl.BlockSpec((H2, 1), resident),            # wo as a column for the reduction
            pl.BlockSpec((1, 1), resident),
        ],
        out_specs=pl.BlockSpec((1, tb), lambda i: (0, i)),  # lane-dense scores
        compiler_params=pltpu.CompilerParams(
            dimension_semantics=("parallel",),          # v7x: shard batch tiles over both TCs
            vmem_limit_bytes=vmem_limit,
        ),
        cost_estimate=cost,
    )(xeT, w1t, b1c, w2t, b2c, wo_col, bo)

    return out[0]                                       # (B,) — score.squeeze(1)


def _pure_jax_reference(x_idx, arch, beta, params):
    emb = params["embedding"]
    B, F_ = x_idx.shape
    D = emb.shape[1]
    xv = jnp.take(emb, x_idx, axis=0)
    prob = jax.nn.softmax(arch.astype(jnp.float32) / beta, axis=0)
    xe = xv * prob[None, :, None]
    h = xe.reshape(B, F_ * D)
    eps = 1e-5
    for (w, b, bn) in ((params["w1"], params["b1"], params["bn1"]),
                       (params["w2"], params["b2"], params["bn2"])):
        gamma, beta_bn, mean, var = bn
        h = h @ w + b
        h = gamma * (h - mean) / jnp.sqrt(var + eps) + beta_bn
        h = jnp.maximum(h, 0.0)
    return (h @ params["wo"] + params["bo"])[:, 0]


if __name__ == "__main__":
    # small, module-consistent shapes
    field_dim = (10, 10, 10, 10)          # opt['field_dim']
    field_num = len(field_dim)
    feature_num = sum(field_dim)
    latent_dim = 8                        # opt['latent_dim']
    mlp_dims = (32, 16)                   # opt['mlp_dims']
    batch = 8
    E = field_num * latent_dim

    key = jax.random.PRNGKey(0)
    ks = jax.random.split(key, 20)

    # embedding: xavier_uniform
    lim = (6.0 / (feature_num + latent_dim)) ** 0.5
    embedding = jax.random.uniform(ks[0], (feature_num, latent_dim),
                                   jnp.float32, -lim, lim)

    def linear(kw, kb, fan_in, fan_out):
        bound = 1.0 / (fan_in ** 0.5)
        w = jax.random.uniform(kw, (fan_in, fan_out), jnp.float32, -bound, bound)
        b = jax.random.uniform(kb, (1, fan_out), jnp.float32, -bound, bound)
        return w, b

    w1, b1 = linear(ks[1], ks[2], E, mlp_dims[0])
    w2, b2 = linear(ks[3], ks[4], mlp_dims[0], mlp_dims[1])
    wo, bo = linear(ks[5], ks[6], mlp_dims[1], 1)

    def bn_params(kg, kb, km, kv, dim):
        gamma = 1.0 + 0.1 * jax.random.normal(kg, (dim,), jnp.float32)
        beta_bn = 0.1 * jax.random.normal(kb, (dim,), jnp.float32)
        mean = 0.1 * jax.random.normal(km, (dim,), jnp.float32)
        var = 1.0 + 0.1 * jnp.abs(jax.random.normal(kv, (dim,), jnp.float32))
        return gamma, beta_bn, mean, var

    bn1 = bn_params(ks[7], ks[8], ks[9], ks[10], mlp_dims[0])
    bn2 = bn_params(ks[11], ks[12], ks[13], ks[14], mlp_dims[1])

    params = dict(embedding=embedding, w1=w1, b1=b1, w2=w2, b2=b2,
                  wo=wo, bo=bo, bn1=bn1, bn2=bn2)

    # x: per-field categorical indices offset into the global feature table
    offsets = jnp.asarray((0,) + tuple(int(sum(field_dim[:i + 1]))
                                       for i in range(field_num - 1)), jnp.int32)

    def make_x(key, b):
        per_field = jnp.stack([
            jax.random.randint(jax.random.fold_in(key, f), (b,), 0, field_dim[f])
            for f in range(field_num)], axis=1).astype(jnp.int32)
        return per_field + offsets[None, :]                  # (b, field_num)

    x_idx = make_x(ks[15], batch)
    arch = jax.random.normal(ks[16], (field_num,), jnp.float32)
    beta = 1.0

    ref = _pure_jax_reference(x_idx, arch, beta, params)

    # f32 run: validates folded weights, batch-on-lanes layout and ragged single block.
    score_f32 = fnn_search_forward(x_idx, arch, beta, params,
                                   compute_dtype=jnp.float32)
    jax.block_until_ready(score_f32)
    assert score_f32.shape == (batch,)
    assert jnp.allclose(score_f32, ref, atol=1e-4, rtol=1e-4), (score_f32, ref)

    # bf16 run (production config): loose tolerance covers bf16 input rounding.
    score = fnn_search_forward(x_idx, arch, beta, params,
                               compute_dtype=jnp.bfloat16)
    jax.block_until_ready(score)
    assert score.shape == (batch,)
    assert jnp.allclose(score, ref, atol=5e-2, rtol=5e-2), (score, ref)

    # larger batch: exercises a multi-step grid (megacore path) + ragged last block.
    batch2 = 300
    x_idx2 = make_x(ks[17], batch2)
    ref2 = _pure_jax_reference(x_idx2, arch, beta, params)
    score2 = fnn_search_forward(x_idx2, arch, beta, params,
                                compute_dtype=jnp.float32)
    jax.block_until_ready(score2)
    assert score2.shape == (batch2,)
    assert jnp.allclose(score2, ref2, atol=1e-4, rtol=1e-4), (score2, ref2)

    print("KERNEL_OK")
</pallas_src>

<mosaic_0001>
module attributes {stable_mosaic.version = 11 : i64} {
  func.func @fnn_mlp_kernel(%arg0: i32, %arg1: memref<32x128xf32, #tpu.memory_space<vmem>>, %arg2: memref<32x32xf32, #tpu.memory_space<vmem>>, %arg3: memref<32x1xf32, #tpu.memory_space<vmem>>, %arg4: memref<16x32xf32, #tpu.memory_space<vmem>>, %arg5: memref<16x1xf32, #tpu.memory_space<vmem>>, %arg6: memref<16x1xf32, #tpu.memory_space<vmem>>, %arg7: memref<1x1xf32, #tpu.memory_space<vmem>>, %arg8: memref<1x128xf32, #tpu.memory_space<vmem>>) attributes {dimension_semantics = [#tpu.dimension_semantics<parallel>], iteration_bounds = array<i64: 1>, scalar_prefetch = 0 : i64, scratch_operands = 0 : i64, tpu.core_type = #tpu.core_type<tc>, window_params = [{transform_indices = @transform_0, window_bounds = array<i64: 32, 128>}, {pipeline_mode = #tpu.pipeline_mode<synchronous>, transform_indices = @transform_1, window_bounds = array<i64: 32, 32>}, {pipeline_mode = #tpu.pipeline_mode<synchronous>, transform_indices = @transform_2, window_bounds = array<i64: 32, 1>}, {pipeline_mode = #tpu.pipeline_mode<synchronous>, transform_indices = @transform_3, window_bounds = array<i64: 16, 32>}, {pipeline_mode = #tpu.pipeline_mode<synchronous>, transform_indices = @transform_4, window_bounds = array<i64: 16, 1>}, {pipeline_mode = #tpu.pipeline_mode<synchronous>, transform_indices = @transform_5, window_bounds = array<i64: 16, 1>}, {pipeline_mode = #tpu.pipeline_mode<synchronous>, transform_indices = @transform_6, window_bounds = array<i64: 1, 1>}, {transform_indices = @transform_7, window_bounds = array<i64: 1, 128>}]} {
    %c0 = arith.constant 0 : index
    %c0_0 = arith.constant 0 : index
    %0 = vector.load %arg2[%c0, %c0_0] : memref<32x32xf32, #tpu.memory_space<vmem>>, vector<32x32xf32>
    %c0_1 = arith.constant 0 : index
    %c0_2 = arith.constant 0 : index
    %1 = vector.load %arg1[%c0_1, %c0_2] : memref<32x128xf32, #tpu.memory_space<vmem>>, vector<32x128xf32>
    %cst = arith.constant dense<0.000000e+00> : vector<32x128xf32>
    %2 = tpu.matmul %0, %1, %cst {dimension_numbers = #tpu.dot_dimension_numbers<[1], [0], [0], [1], [0, 0, 1, 1], [], []>} : vector<32x32xf32>, vector<32x128xf32>, vector<32x128xf32> -> vector<32x128xf32>
    %c0_3 = arith.constant 0 : index
    %c0_4 = arith.constant 0 : index
    %3 = vector.load %arg3[%c0_3, %c0_4] : memref<32x1xf32, #tpu.memory_space<vmem>>, vector<32x1xf32>
    %4 = vector.broadcast %3 : vector<32x1xf32> to vector<32x128xf32>
    %5 = arith.addf %2, %4 : vector<32x128xf32>
    %cst_5 = arith.constant 0.000000e+00 : f32
    %6 = vector.broadcast %cst_5 : f32 to vector<32x128xf32>
    %7 = arith.maximumf %5, %6 : vector<32x128xf32>
    %c0_6 = arith.constant 0 : index
    %c0_7 = arith.constant 0 : index
    %8 = vector.load %arg4[%c0_6, %c0_7] : memref<16x32xf32, #tpu.memory_space<vmem>>, vector<16x32xf32>
    %cst_8 = arith.constant dense<0.000000e+00> : vector<16x128xf32>
    %9 = tpu.matmul %8, %7, %cst_8 {dimension_numbers = #tpu.dot_dimension_numbers<[1], [0], [0], [1], [0, 0, 1, 1], [], []>} : vector<16x32xf32>, vector<32x128xf32>, vector<16x128xf32> -> vector<16x128xf32>
    %c0_9 = arith.constant 0 : index
    %c0_10 = arith.constant 0 : index
    %10 = vector.load %arg5[%c0_9, %c0_10] : memref<16x1xf32, #tpu.memory_space<vmem>>, vector<16x1xf32>
    %11 = vector.broadcast %10 : vector<16x1xf32> to vector<16x128xf32>
    %12 = arith.addf %9, %11 : vector<16x128xf32>
    %cst_11 = arith.constant 0.000000e+00 : f32
    %13 = vector.broadcast %cst_11 : f32 to vector<16x128xf32>
    %14 = arith.maximumf %12, %13 : vector<16x128xf32>
    %c0_12 = arith.constant 0 : index
    %c0_13 = arith.constant 0 : index
    %15 = vector.load %arg6[%c0_12, %c0_13] : memref<16x1xf32, #tpu.memory_space<vmem>>, vector<16x1xf32>
    %16 = vector.broadcast %15 : vector<16x1xf32> to vector<16x128xf32>
    %17 = arith.mulf %14, %16 : vector<16x128xf32>
    %cst_14 = arith.constant dense<0.000000e+00> : vector<128xf32>
    %18 = vector.multi_reduction <add>, %17, %cst_14 [0] : vector<16x128xf32> to vector<128xf32>
    %19 = vector.shape_cast %18 : vector<128xf32> to vector<1x128xf32>
    %c0_15 = arith.constant 0 : index
    %c0_16 = arith.constant 0 : index
    %20 = vector.load %arg7[%c0_15, %c0_16] : memref<1x1xf32, #tpu.memory_space<vmem>>, vector<1x1xf32>
    %21 = vector.broadcast %20 : vector<1x1xf32> to vector<1x128xf32>
    %22 = arith.addf %19, %21 : vector<1x128xf32>
    %c0_17 = arith.constant 0 : index
    %c0_18 = arith.constant 0 : index
    %23 = vector.load %arg8[%c0_17, %c0_18] : memref<1x128xf32, #tpu.memory_space<vmem>>, vector<1x128xf32>
    tpu.vector_store %arg8[%c0_17, %c0_18], %22 {strides = array<i32>} : memref<1x128xf32, #tpu.memory_space<vmem>>, vector<1x128xf32>,
    return
  }
  func.func @transform_0(%arg0: i32) -> (i32, i32) {
    %c0_i32 = arith.constant 0 : i32
    %c0_i32_0 = arith.constant 0 : i32
    return %c0_i32, %arg0 : i32, i32
  }
  func.func @transform_1(%arg0: i32) -> (i32, i32) {
    %c0_i32 = arith.constant 0 : i32
    %c0_i32_0 = arith.constant 0 : i32
    %c0_i32_1 = arith.constant 0 : i32
    return %c0_i32, %c0_i32_0 : i32, i32
  }
  func.func @transform_2(%arg0: i32) -> (i32, i32) {
    %c0_i32 = arith.constant 0 : i32
    %c0_i32_0 = arith.constant 0 : i32
    %c0_i32_1 = arith.constant 0 : i32
    return %c0_i32, %c0_i32_0 : i32, i32
  }
  func.func @transform_3(%arg0: i32) -> (i32, i32) {
    %c0_i32 = arith.constant 0 : i32
    %c0_i32_0 = arith.constant 0 : i32
    %c0_i32_1 = arith.constant 0 : i32
    return %c0_i32, %c0_i32_0 : i32, i32
  }
  func.func @transform_4(%arg0: i32) -> (i32, i32) {
    %c0_i32 = arith.constant 0 : i32
    %c0_i32_0 = arith.constant 0 : i32
    %c0_i32_1 = arith.constant 0 : i32
    return %c0_i32, %c0_i32_0 : i32, i32
  }
  func.func @transform_5(%arg0: i32) -> (i32, i32) {
    %c0_i32 = arith.constant 0 : i32
    %c0_i32_0 = arith.constant 0 : i32
    %c0_i32_1 = arith.constant 0 : i32
    return %c0_i32, %c0_i32_0 : i32, i32
  }
  func.func @transform_6(%arg0: i32) -> (i32, i32) {
    %c0_i32 = arith.constant 0 : i32
    %c0_i32_0 = arith.constant 0 : i32
    %c0_i32_1 = arith.constant 0 : i32
    return %c0_i32, %c0_i32_0 : i32, i32
  }
  func.func @transform_7(%arg0: i32) -> (i32, i32) {
    %c0_i32 = arith.constant 0 : i32
    %c0_i32_0 = arith.constant 0 : i32
    return %c0_i32, %arg0 : i32, i32
  }
}

</mosaic_0001>

<bundles_post_ra>
// kernel: tpu_custom_call.1
= control target key start
LH: loop header
LB: loop body
LE: loop exit
PB: predicated region body
PF: predicated region fallthrough
CT: control target
= control target key end

     0   :  { %s486_s0 = inlined_call_operand.vmem [shape: f32[32,8], index: 0, kind: input, shape index: {}]   ;;  %s487_s1 = inlined_call_operand.vmem [shape: f32[32,32], index: 1, kind: input, shape index: {}]   ;;  %s488_s2 = inlined_call_operand.vmem [shape: f32[32,1], index: 2, kind: input, shape index: {}]   ;;  %s489_s3 = inlined_call_operand.vmem [shape: f32[16,32], index: 3, kind: input, shape index: {}]   ;;  %s490_s4 = inlined_call_operand.vmem [shape: f32[16,1], index: 4, kind: input, shape index: {}]   ;;  %s491_s5 = inlined_call_operand.vmem [shape: f32[16,1], index: 5, kind: input, shape index: {}]   ;;  %s492_s6 = inlined_call_operand.<no memory space> [shape: f32[1,1], index: 6, kind: input, shape index: {}]   ;;  %s493_s7 = inlined_call_operand.hbm [shape: f32[1,8], index: 7, kind: output, shape index: {}]  }
   0x1   :  { %v12_v0 = vstv %s492_s6 }
   0x2   :  { %13 = vst [vmem:[#allocation2] sm:$0x1] %v12_v0 }
   0x3   :  { %v36_v1 = vld [vmem:[%s486_s0 + $0x18] sm:$0xff]  ;;  %v35_v2 = vld [vmem:[%s486_s0 + $0x10] sm:$0xff]  ;;  %vm61_vm0 = vcmask 261120   ;;  %v29_v3 = vld [vmem:[%s487_s1] sm:$0xff]  ;;  %v378_v4 = vmov 0  }
   0x4   :  { %327 = vmatprep.subr.mxu0 %v36_v1  ;;  %354 = vset.pattern.permute.xlu0 %v378_v4  ;;  %v34_v5 = vld [vmem:[%s486_s0 + $0x8] sm:$0xff]  ;;  %v40_v6 = vld [vmem:[%s488_s2 + $0x18] sm:$0xff]  ;;  %v33_v8 = vld [vmem:[%s486_s0] sm:$0xff] }
   0x5   :  { %328 = vmatpush3.msra.mxu0 %v36_v1  ;;  %335 = vmatprep.mubr.msk.f32.mxu0 %vm61_vm0, %v29_v3  ;;  %v38_v7 = vld [vmem:[%s488_s2 + $0x8] sm:$0xff]  ;;  %v39_v9 = vld [vmem:[%s488_s2 + $0x10] sm:$0xff] }
   0x6   :  { %329 = vmatprep.subr.mxu0 %v35_v2  ;;  %58 = vperm.xlu0 %354, %v40_v6  }
   0x7   :  { %330 = vmatpush3.msra.mxu0 %v35_v2  ;;  %355 = vset.pattern.permute.xlu1 %v378_v4 }
   0x8   :  { %331 = vmatprep.subr.mxu0 %v34_v5  ;;  %48 = vperm.xlu1 %355, %v38_v7  }
   0x9   :  { %14 = vsyncpa [#allocation4], 0  ;;  %332 = vmatpush3.msra.mxu0 %v34_v5  ;;  %v30_v10 = vld [vmem:[%s487_s1 + $0x8] sm:$0xff]  ;;  %v37_v11 = vld [vmem:[%s488_s2] sm:$0xff]  ;;  %v287_v49 = vlaneseq }
   0xa   :  { %333 = vmatprep.subr.mxu0 %v33_v8  ;;  %v31_v12 = vld [vmem:[%s487_s1 + $0x10] sm:$0xff]  ;;  %53 = vperm.xlu0 %354, %v39_v9   ;;  %v165_v13 = vld [vmem:[%s490_s4] sm:$0xff]  ;;  %v32_v14 = vld [vmem:[%s487_s1 + $0x18] sm:$0xff] }
   0xb   :  { %334 = vmatpush3.msra.mxu0 %v33_v8  ;;  %v166_v15 = vld [vmem:[%s490_s4 + $0x8] sm:$0xff]  ;;  %v260_v16 = vld [vmem:[%s491_s5] sm:$0xff]  ;;  %v288_v52 = vshrl.u32 %v287_v49, 7 }
   0xc   :  { %336 = vmatmul.mubr.msk.f32.vlgmr.msra.gmra.mxu0 %vm61_vm0, %v30_v10  ;;  %43 = vperm.xlu1 %355, %v37_v11   ;;  %v261_v17 = vld [vmem:[%s491_s5 + $0x8] sm:$0xff]  ;;  %v281_v18 = vld [vmem:[#allocation2] sm:$0x1] }
   0xd   :  { %338 = vmatprep.mubr.msk.f32.mxu0 %vm61_vm0, %v31_v12  ;;  %v163_v19 = vld [vmem:[%s489_s3] sm:$0xff]  ;;  %v164_v36 = vld [vmem:[%s489_s3 + $0x8] sm:$0xff]  ;;  %v289_v55 = vsub.s32 0, %v288_v52  ;;  %s379_s3 = smov [#allocation3]  }
   0xe   :  { %169 = vperm.xlu0 %354, %v165_v13   ;;  %349 = vmatprep.mubr.msk.f32.mxu1 %vm61_vm0, %v163_v19  ;;  %s299_s6 = sshll.u32 %s379_s3, 4  ;;  %s300_s6 = int_to_ptr.vmem [resolvable:$true] %s299_s6 }
   0xf   :  { %s356_s10 = scalar_lea.vmem %s300_s6, 16  ;;  %s360_s11 = scalar_lea.vmem %s300_s6, 32 }
  0x10   :  { %339 = vmatmul.mubr.msk.f32.gmra.mxu0 %vm61_vm0, %v32_v14  ;;  %174 = vperm.xlu1 %355, %v166_v15   ;;  %p357_p0 = scmp.ne.s32.totalorder %s300_s6, %s356_s10  ;;  %p361_p1 = scmp.lt.s32.totalorder %s300_s6, %s300_s6 }
  0x11   :  { %p362_p2 = scmp.lt.s32.totalorder %s360_s11, %s356_s10 }
  0x12   :  { %264 = vperm.xlu0 %354, %v260_v16  }
  0x13   :  { %p363_p3 = por %p362_p2, %p361_p1 }
  0x14   :  { %269 = vperm.xlu1 %355, %v261_v17  }
  0x15   :  { %p364_p4 = pnand %p363_p3, %p357_p0 }
  0x16   :  { %284 = vperm.xlu0 %354, %v281_v18  }
  0x81   :  { %v59_v20 = vpop.permute.xlu0 %58 }
  0x83   :  { %v49_v22 = vpop.permute.xlu1 %48 }
  0x85   :  { %v54_v26 = vpop.permute.xlu0 %53 }
  0x87   :  { %v44_v31 = vpop.permute.xlu1 %43 }
  0x89   :  { %v170_v37 = vpop.permute.xlu0 %169 }
  0x8b   :  { %v175_v38 = vpop.permute.xlu1 %174 }
  0x8d   :  { %v265_v45 = vpop.permute.xlu0 %264 }
  0x8f   :  { %v270_v46 = vpop.permute.xlu1 %269 }
  0x91   :  { %v285_v57 = vpop.permute.xlu0 %284 }
  0x92   :  { %v290_v59 = vrot.slane %v285_v57, %v289_v55 }
  0xcc   :  { %v337_v21 = vpop.f32.mrf.mxu0 }
  0xcd   :  { %v146_v28 = vadd.f32 %v337_v21, %v49_v22 }
  0xce   :  { %v140_v23 = vpop.f32.mrf.mxu0 }
  0xcf   :  { %v141_v32 = vadd.f32 %v140_v23, %v44_v31  ;;  %v160_v34 = vmax.f32 %v146_v28, 0.0 }
  0xd0   :  { %v340_v24 = vpop.f32.mrf.mxu0 }
  0xd1   :  { %v156_v25 = vadd.f32 %v340_v24, %v59_v20  ;;  %v159_v35 = vmax.f32 %v141_v32, 0.0 }
  0xd2   :  { %v150_v27 = vpop.f32.mrf.mxu0 }
  0xd3   :  { %v162_v29 = vmax.f32 %v156_v25, 0.0  ;;  %v151_v30 = vadd.f32 %v150_v27, %v54_v26 }
  0xd5   :  { %v161_v33 = vmax.f32 %v151_v30, 0.0  ;;  %341 = vmatprep.subr.mxu1 %v162_v29 }
  0xd6   :  { %342 = vmatpush3.msra.mxu1 %v162_v29 }
  0xd7   :  { %343 = vmatprep.subr.mxu1 %v161_v33 }
  0xd8   :  { %344 = vmatpush3.msra.mxu1 %v161_v33 }
  0xd9   :  { %345 = vmatprep.subr.mxu1 %v160_v34 }
  0xda   :  { %346 = vmatpush3.msra.mxu1 %v160_v34 }
  0xdb   :  { %347 = vmatprep.subr.mxu1 %v159_v35 }
  0xdc   :  { %348 = vmatpush3.msra.mxu1 %v159_v35 }
  0xdd   :  { %350 = vmatmul.mubr.msk.f32.vlgmr.msra.gmra.mxu1 %vm61_vm0, %v164_v36 }
 0x19d   :  { %v351_v39 = vpop.f32.mrf.mxu1 }
 0x19e   :  { %v255_v40 = vadd.f32 %v351_v39, %v175_v38 }
 0x19f   :  { %v249_v41 = vpop.f32.mrf.mxu1 }
 0x1a0   :  { %v259_v42 = vmax.f32 %v255_v40, 0.0  ;;  %v250_v43 = vadd.f32 %v249_v41, %v170_v37 }
 0x1a2   :  { %v258_v44 = vmax.f32 %v250_v43, 0.0  ;;  %v273_v47 = vmul.f32 %v270_v46, %v259_v42 }
 0x1a4   :  { %v272_v48 = vmul.f32 %v265_v45, %v258_v44 }
 0x1a6   :  { %v274_v50 = vadd.f32 %v273_v47, %v272_v48 }
 0x1a8   :  { %v275_v51 = vrot.slane %v274_v50, 4 }
 0x1aa   :  { %v276_v53 = vadd.f32 %v275_v51, %v274_v50 }
 0x1ac   :  { %v277_v54 = vrot.slane %v276_v53, 2 }
 0x1ae   :  { %v278_v56 = vadd.f32 %v277_v54, %v276_v53 }
 0x1b0   :  { %v279_v58 = vrot.slane %v278_v56, 1 }
 0x1b2   :  { %v280_v60 = vadd.f32 %v279_v58, %v278_v56 }
 0x1b4   :  { %v291_v61 = vadd.f32 %v290_v59, %v280_v60 }
 0x1b6   :  { %292 = vst [vmem:[#allocation3] sm:$0x1] %v291_v61 }
 0x1b7   :  { %367 = shalt.err (!%p364_p4)
}
 0x1b8   :  { %302 = dma.vmem_to_hbm [thread:$0]  %s300_s6, 16, %s493_s7, [#allocation4]  }
 0x1b9   :  { %376 = dma.done.wait [#allocation4], 16  }
 0x1ba   :  { %377 = vsyncadd [#allocation4], 4294967280 }
 0x1bb   :  { %306 = vsyncpa [#allocation4], 1 }

</bundles_post_ra>
